<compile_context>
chip_gen: v7x
topology: tpu7x:2x2x1
jax: 0.10.0
libtpu: 0.0.40
codegen_flags: <defaults>
</compile_context>

<pallas_src>
import jax
import jax.numpy as jnp
from jax.experimental import pallas as pl
from jax.experimental.pallas import tpu as pltpu

LANE = 128
HIDDEN = 256


def _round_up(x, m):
    return (x + m - 1) // m * m


def actor_mlp_kernel(x_ref, w1_ref, b1_ref, w2_ref, b2_ref, w3_ref, b3_ref, o_ref):
    # layer 1: Linear(state_dim -> size) + ReLU
    # bf16 MXU inputs, f32 accumulation; bias add / ReLU stay in f32 (v5e VPU).
    x = x_ref[...].astype(jnp.bfloat16)
    y = jnp.dot(x, w1_ref[...], preferred_element_type=jnp.float32)
    y = jnp.maximum(y + b1_ref[...], 0.0)
    # layer 2: Linear(size -> size) + ReLU
    y = jnp.dot(y.astype(jnp.bfloat16), w2_ref[...], preferred_element_type=jnp.float32)
    y = jnp.maximum(y + b2_ref[...], 0.0)
    # output head: Linear(size -> n_actions_padded), raw logits (no activation)
    logits = jnp.dot(y.astype(jnp.bfloat16), w3_ref[...], preferred_element_type=jnp.float32)
    o_ref[...] = (logits + b3_ref[...]).astype(o_ref.dtype)


def actor_discrete_forward(x, params, *, tile_b=512):
    """x: [batch, state_dim] float32.
    params: bf16 weights stored (in, out) + f32 (1, out) biases.
    Returns logits [batch, n_actions] float32."""
    w1, b1, w2, b2, w3, b3 = params
    batch, state_dim = x.shape
    hidden = w1.shape[1]
    n_actions = w3.shape[1]

    # --- pad once in the wrapper to MXU/lane-friendly shapes ---
    state_pad = _round_up(state_dim, LANE)        # aligned K feed for first matmul
    act_pad = _round_up(n_actions, LANE)          # lane-dense logits slab
    tile_b = _round_up(max(8, min(tile_b, _round_up(batch, 8))), 8)
    batch_pad = _round_up(batch, tile_b)

    x_p = jnp.pad(x, ((0, batch_pad - batch), (0, state_pad - state_dim)))
    w1_p = jnp.pad(w1, ((0, state_pad - state_dim), (0, 0)))
    w3_p = jnp.pad(w3, ((0, 0), (0, act_pad - n_actions)))
    b3_p = jnp.pad(b3, ((0, 0), (0, act_pad - n_actions)))

    grid = (batch_pad // tile_b,)

    flops = 2 * batch_pad * (state_pad * hidden + hidden * hidden + hidden * act_pad)
    bytes_accessed = (
        x_p.size * 4
        + (w1_p.size + w2.size + w3_p.size) * 2
        + (b1.size + b2.size + b3_p.size) * 4
        + batch_pad * act_pad * 4)

    # VMEM budget: double-buffered x/out tiles + resident weights + activation
    # scratch, with 2x headroom; keep below v7x's 32 MiB scoped default.
    vmem_bytes = 2 * (
        2 * tile_b * state_pad * 4
        + 2 * tile_b * act_pad * 4
        + 2 * (w1_p.size + w2.size + w3_p.size) * 2
        + 2 * (b1.size + b2.size + b3_p.size) * 4
        + 2 * tile_b * hidden * 4)
    vmem_bytes = int(min(max(vmem_bytes, 4 << 20), 30 << 20))

    out = pl.pallas_call(
        actor_mlp_kernel,
        out_shape=jax.ShapeDtypeStruct((batch_pad, act_pad), jnp.float32),
        grid_spec=pltpu.PrefetchScalarGridSpec(
            num_scalar_prefetch=0,
            grid=grid,
            in_specs=[
                pl.BlockSpec((tile_b, state_pad), lambda i: (i, 0)),   # x batch tile
                pl.BlockSpec((state_pad, hidden), lambda i: (0, 0)),   # w1 (VMEM-resident)
                pl.BlockSpec((1, hidden), lambda i: (0, 0)),           # b1
                pl.BlockSpec((hidden, hidden), lambda i: (0, 0)),      # w2
                pl.BlockSpec((1, hidden), lambda i: (0, 0)),           # b2
                pl.BlockSpec((hidden, act_pad), lambda i: (0, 0)),     # w3
                pl.BlockSpec((1, act_pad), lambda i: (0, 0)),          # b3
            ],
            out_specs=pl.BlockSpec((tile_b, act_pad), lambda i: (i, 0)),
        ),
        compiler_params=pltpu.CompilerParams(
            dimension_semantics=("parallel",),
            vmem_limit_bytes=vmem_bytes,
        ),
        cost_estimate=pl.CostEstimate(
            flops=flops, transcendentals=0, bytes_accessed=bytes_accessed),
    )(x_p, w1_p, b1, w2, b2, w3_p, b3_p)

    return out[:batch, :n_actions]


def init_params(key, state_dim, n_actions, size=256):
    """Mirrors the PyTorch module's init:
       - weights ~ U(-0.001, 0.001) (torch.nn.init.uniform_ on .weight), stored
         as (in, out) in bf16 for the MXU fast path;
       - biases  ~ U(-1/sqrt(fan_in), 1/sqrt(fan_in)) (PyTorch Linear default),
         kept in f32 (added on the VPU in f32)."""
    ks = jax.random.split(key, 6)

    def w(k, fan_in, fan_out):
        return jax.random.uniform(
            k, (fan_in, fan_out), jnp.float32, -0.001, 0.001).astype(jnp.bfloat16)

    def b(k, fan_in, fan_out):
        bound = 1.0 / jnp.sqrt(jnp.float32(fan_in))
        return jax.random.uniform(k, (1, fan_out), jnp.float32, -bound, bound)

    return (w(ks[0], state_dim, size), b(ks[1], state_dim, size),
            w(ks[2], size, size),      b(ks[3], size, size),
            w(ks[4], size, n_actions), b(ks[5], size, n_actions))


def reference_forward(x, params):
    """Pure-JAX reference mirroring the kernel's dtype flow
    (bf16 MXU inputs, f32 accumulate + elementwise)."""
    w1, b1, w2, b2, w3, b3 = params
    y = jnp.dot(x.astype(jnp.bfloat16), w1, preferred_element_type=jnp.float32)
    y = jnp.maximum(y + b1, 0.0)
    y = jnp.dot(y.astype(jnp.bfloat16), w2, preferred_element_type=jnp.float32)
    y = jnp.maximum(y + b2, 0.0)
    return jnp.dot(y.astype(jnp.bfloat16), w3, preferred_element_type=jnp.float32) + b3


if __name__ == "__main__":
    key = jax.random.PRNGKey(0)
    k_x, k_p = jax.random.split(key)

    batch, state_dim, n_actions, size = 24, 32, 16, 256

    x = jax.random.normal(k_x, (batch, state_dim), jnp.float32)
    params = init_params(k_p, state_dim, n_actions, size)

    # Small tile so the demo exercises the batch grid (3 grid steps);
    # production rollouts should use the default tile_b=512.
    logits = actor_discrete_forward(x, params, tile_b=8)
    logits = jax.block_until_ready(logits)

    ref = reference_forward(x, params)
    assert logits.shape == (batch, n_actions)
    assert jnp.allclose(logits, ref, atol=1e-3, rtol=1e-3), float(
        jnp.max(jnp.abs(logits - ref)))

    # TODO(synk): get_action/log_prob Categorical sampling is left to plain JAX
    # (jax.random.categorical on these logits); only the forward pass is a kernel.

    print("KERNEL_OK")
</pallas_src>

<mosaic_0001>
module attributes {stable_mosaic.version = 11 : i64} {
  func.func @actor_mlp_kernel(%arg0: i32, %arg1: memref<8x128xf32, #tpu.memory_space<vmem>>, %arg2: memref<128x256xbf16, #tpu.memory_space<vmem>>, %arg3: memref<1x256xf32, #tpu.memory_space<vmem>>, %arg4: memref<256x256xbf16, #tpu.memory_space<vmem>>, %arg5: memref<1x256xf32, #tpu.memory_space<vmem>>, %arg6: memref<256x128xbf16, #tpu.memory_space<vmem>>, %arg7: memref<1x128xf32, #tpu.memory_space<vmem>>, %arg8: memref<8x128xf32, #tpu.memory_space<vmem>>) attributes {dimension_semantics = [#tpu.dimension_semantics<parallel>], iteration_bounds = array<i64: 3>, scalar_prefetch = 0 : i64, scratch_operands = 0 : i64, tpu.core_type = #tpu.core_type<tc>, window_params = [{transform_indices = @transform_0, window_bounds = array<i64: 8, 128>}, {pipeline_mode = #tpu.pipeline_mode<synchronous>, transform_indices = @transform_1, window_bounds = array<i64: 128, 256>}, {pipeline_mode = #tpu.pipeline_mode<synchronous>, transform_indices = @transform_2, window_bounds = array<i64: 1, 256>}, {pipeline_mode = #tpu.pipeline_mode<synchronous>, transform_indices = @transform_3, window_bounds = array<i64: 256, 256>}, {pipeline_mode = #tpu.pipeline_mode<synchronous>, transform_indices = @transform_4, window_bounds = array<i64: 1, 256>}, {pipeline_mode = #tpu.pipeline_mode<synchronous>, transform_indices = @transform_5, window_bounds = array<i64: 256, 128>}, {pipeline_mode = #tpu.pipeline_mode<synchronous>, transform_indices = @transform_6, window_bounds = array<i64: 1, 128>}, {transform_indices = @transform_7, window_bounds = array<i64: 8, 128>}]} {
    %c0 = arith.constant 0 : index
    %c0_0 = arith.constant 0 : index
    %0 = vector.load %arg1[%c0, %c0_0] : memref<8x128xf32, #tpu.memory_space<vmem>>, vector<8x128xf32>
    %1 = arith.truncf %0 : vector<8x128xf32> to vector<8x128xbf16>
    %c0_1 = arith.constant 0 : index
    %c0_2 = arith.constant 0 : index
    %2 = vector.load %arg2[%c0_1, %c0_2] : memref<128x256xbf16, #tpu.memory_space<vmem>>, vector<128x256xbf16>
    %cst = arith.constant dense<0.000000e+00> : vector<8x256xf32>
    %3 = tpu.matmul %1, %2, %cst {dimension_numbers = #tpu.dot_dimension_numbers<[1], [0], [0], [1], [0, 0, 1, 1], [], []>} : vector<8x128xbf16>, vector<128x256xbf16>, vector<8x256xf32> -> vector<8x256xf32>
    %c0_3 = arith.constant 0 : index
    %c0_4 = arith.constant 0 : index
    %4 = vector.load %arg3[%c0_3, %c0_4] : memref<1x256xf32, #tpu.memory_space<vmem>>, vector<1x256xf32>
    %5 = vector.broadcast %4 : vector<1x256xf32> to vector<8x256xf32>
    %6 = arith.addf %3, %5 : vector<8x256xf32>
    %cst_5 = arith.constant 0.000000e+00 : f32
    %7 = vector.broadcast %cst_5 : f32 to vector<8x256xf32>
    %8 = arith.maximumf %6, %7 : vector<8x256xf32>
    %9 = arith.truncf %8 : vector<8x256xf32> to vector<8x256xbf16>
    %c0_6 = arith.constant 0 : index
    %c0_7 = arith.constant 0 : index
    %10 = vector.load %arg4[%c0_6, %c0_7] : memref<256x256xbf16, #tpu.memory_space<vmem>>, vector<256x256xbf16>
    %cst_8 = arith.constant dense<0.000000e+00> : vector<8x256xf32>
    %11 = tpu.matmul %9, %10, %cst_8 {dimension_numbers = #tpu.dot_dimension_numbers<[1], [0], [0], [1], [0, 0, 1, 1], [], []>} : vector<8x256xbf16>, vector<256x256xbf16>, vector<8x256xf32> -> vector<8x256xf32>
    %c0_9 = arith.constant 0 : index
    %c0_10 = arith.constant 0 : index
    %12 = vector.load %arg5[%c0_9, %c0_10] : memref<1x256xf32, #tpu.memory_space<vmem>>, vector<1x256xf32>
    %13 = vector.broadcast %12 : vector<1x256xf32> to vector<8x256xf32>
    %14 = arith.addf %11, %13 : vector<8x256xf32>
    %cst_11 = arith.constant 0.000000e+00 : f32
    %15 = vector.broadcast %cst_11 : f32 to vector<8x256xf32>
    %16 = arith.maximumf %14, %15 : vector<8x256xf32>
    %17 = arith.truncf %16 : vector<8x256xf32> to vector<8x256xbf16>
    %c0_12 = arith.constant 0 : index
    %c0_13 = arith.constant 0 : index
    %18 = vector.load %arg6[%c0_12, %c0_13] : memref<256x128xbf16, #tpu.memory_space<vmem>>, vector<256x128xbf16>
    %cst_14 = arith.constant dense<0.000000e+00> : vector<8x128xf32>
    %19 = tpu.matmul %17, %18, %cst_14 {dimension_numbers = #tpu.dot_dimension_numbers<[1], [0], [0], [1], [0, 0, 1, 1], [], []>} : vector<8x256xbf16>, vector<256x128xbf16>, vector<8x128xf32> -> vector<8x128xf32>
    %c0_15 = arith.constant 0 : index
    %c0_16 = arith.constant 0 : index
    %20 = vector.load %arg7[%c0_15, %c0_16] : memref<1x128xf32, #tpu.memory_space<vmem>>, vector<1x128xf32>
    %21 = vector.broadcast %20 : vector<1x128xf32> to vector<8x128xf32>
    %22 = arith.addf %19, %21 : vector<8x128xf32>
    %c0_17 = arith.constant 0 : index
    %c0_18 = arith.constant 0 : index
    %23 = vector.load %arg8[%c0_17, %c0_18] : memref<8x128xf32, #tpu.memory_space<vmem>>, vector<8x128xf32>
    tpu.vector_store %arg8[%c0_17, %c0_18], %22 {strides = array<i32>} : memref<8x128xf32, #tpu.memory_space<vmem>>, vector<8x128xf32>,
    return
  }
  func.func @transform_0(%arg0: i32) -> (i32, i32) {
    %c0_i32 = arith.constant 0 : i32
    %c0_i32_0 = arith.constant 0 : i32
    return %arg0, %c0_i32 : i32, i32
  }
  func.func @transform_1(%arg0: i32) -> (i32, i32) {
    %c0_i32 = arith.constant 0 : i32
    %c0_i32_0 = arith.constant 0 : i32
    %c0_i32_1 = arith.constant 0 : i32
    return %c0_i32, %c0_i32_0 : i32, i32
  }
  func.func @transform_2(%arg0: i32) -> (i32, i32) {
    %c0_i32 = arith.constant 0 : i32
    %c0_i32_0 = arith.constant 0 : i32
    %c0_i32_1 = arith.constant 0 : i32
    return %c0_i32, %c0_i32_0 : i32, i32
  }
  func.func @transform_3(%arg0: i32) -> (i32, i32) {
    %c0_i32 = arith.constant 0 : i32
    %c0_i32_0 = arith.constant 0 : i32
    %c0_i32_1 = arith.constant 0 : i32
    return %c0_i32, %c0_i32_0 : i32, i32
  }
  func.func @transform_4(%arg0: i32) -> (i32, i32) {
    %c0_i32 = arith.constant 0 : i32
    %c0_i32_0 = arith.constant 0 : i32
    %c0_i32_1 = arith.constant 0 : i32
    return %c0_i32, %c0_i32_0 : i32, i32
  }
  func.func @transform_5(%arg0: i32) -> (i32, i32) {
    %c0_i32 = arith.constant 0 : i32
    %c0_i32_0 = arith.constant 0 : i32
    %c0_i32_1 = arith.constant 0 : i32
    return %c0_i32, %c0_i32_0 : i32, i32
  }
  func.func @transform_6(%arg0: i32) -> (i32, i32) {
    %c0_i32 = arith.constant 0 : i32
    %c0_i32_0 = arith.constant 0 : i32
    %c0_i32_1 = arith.constant 0 : i32
    return %c0_i32, %c0_i32_0 : i32, i32
  }
  func.func @transform_7(%arg0: i32) -> (i32, i32) {
    %c0_i32 = arith.constant 0 : i32
    %c0_i32_0 = arith.constant 0 : i32
    return %arg0, %c0_i32 : i32, i32
  }
}

</mosaic_0001>

<bundles_post_ra>
// kernel: tpu_custom_call.1
= control target key start
LH: loop header
LB: loop body
LE: loop exit
PB: predicated region body
PF: predicated region fallthrough
CT: control target
= control target key end

     0   :  { %12 = vsyncpa [#allocation3], 0  ;;  %s1815_s0 = inlined_call_operand.hbm [shape: f32[24,128], index: 0, kind: input, shape index: {}]   ;;  %s1816_s1 = inlined_call_operand.hbm [shape: bf16[128,256], index: 1, kind: input, shape index: {}]   ;;  %s1817_s2 = inlined_call_operand.vmem [shape: f32[1,256], index: 2, kind: input, shape index: {}]   ;;  %s1818_s3 = inlined_call_operand.hbm [shape: bf16[256,256], index: 3, kind: input, shape index: {}]   ;;  %s1819_s4 = inlined_call_operand.vmem [shape: f32[1,256], index: 4, kind: input, shape index: {}]   ;;  %s1820_s5 = inlined_call_operand.hbm [shape: bf16[256,128], index: 5, kind: input, shape index: {}]   ;;  %s1821_s6 = inlined_call_operand.vmem [shape: f32[1,128], index: 6, kind: input, shape index: {}]   ;;  %s1822_s7 = inlined_call_operand.hbm [shape: f32[24,128], index: 7, kind: output, shape index: {}]  }
   0x1   :  { %14 = vsyncpa [#allocation3 + $0x1], 0 }
   0x2   :  { %15 = vsyncpa [#allocation6], 0 }
   0x3   :  { %16 = vsyncpa [#allocation9], 0 }
   0x4   :  { %17 = vsyncpa [#allocation4], 0 }
   0x5   :  { %19 = vsyncpa [#allocation4 + $0x1], 0  ;;  %s1547_s24 = smov 0   ;;  %s1549_s25 = smov 0  }
   0x6   :  { %s1551_s26 = smov 0   ;;  %s1553_s27 = smov 0  }
   0x7 LB: > { %s1568_s28 = sadd.s32 4294967295, %s1495_s27   ;;  %s1032_s29 = sadd.s32 4294967294, %s1495_s27   ;;  %s1495_s27 = sphi %s1553_s27, %s1847_s27   ;;  %s1491_s26 = sphi %s1551_s26, %s1846_s26   ;;  %s1487_s25 = sphi %s1549_s25, %s1845_s25   ;;  %s1483_s24 = sphi %s1547_s24, %s1844_s24  }
   0x8   : > { %p45_p0 = scmp.ne.s32.totalorder %s1487_s25, %s1483_s24  ;;  %p1823_p1 = scmp.eq.s32.totalorder %s1568_s28, 0 }
   0x9   : > { %p201_p3 = scmp.eq.s32.totalorder %s1032_s29, 2  ;;  %p1033_p5 = scmp.ge.s32.totalorder %s1495_s27, 1 }
   0xa   : > { %p1577_p4 = por %p1823_p1, %p45_p0  ;;  %p208_p7 = scmp.lt.s32.totalorder %s1495_s27, 4 }
   0xb   : > { %p1582_p6 = por %p201_p3, %p45_p0  ;;  %s1497_s10 = smov [#allocation5]  }
   0xc   : > { %s1827_s30 = scalar_select %p1577_p4, 1, 0 }
   0xd   : > { %s1828_s8 = scalar_select %p1582_p6, 1, 0 }
   0xe   : > { %p1587_p8 = pnand %p1033_p5, %p208_p7  ;;  %s220_s11 = sshll.u32 %s1497_s10, 4  ;;  %s1591_s11 = int_to_ptr.vmem [resolvable:$true] %s220_s11 }
   0xf   : > { %1829 = sst [smem:[#allocation15_spill]] %s1828_s8  ;;  %s1498_s13 = smov [#allocation7]  }
  0x10   : > { %s1830_s9 = scalar_select %p1587_p8, 1, 0 }
  0x11   : > { %p1153_p9 = pneg %p1587_p8  ;;  %s236_s14 = sshll.u32 %s1498_s13, 4  ;;  %s1601_s14 = int_to_ptr.vmem [resolvable:$true] %s236_s14 }
  0x12   : > { %s1499_s15 = smov [#allocation8]   ;;  %s1307_s19 = scalar_lea.hbm %s1816_s1, 2048 }
  0x13   : > { %p1597_p10 = pnand %p1153_p9, %p1823_p1  ;;  %s1603_s16 = sshll.u32 %s1499_s15, 4  ;;  %s253_s16 = int_to_ptr.vmem [resolvable:$true] %s1603_s16 }
  0x14   : > { %p1308_p11 = scmp.ne.s32.totalorder %s1816_s1, %s1307_s19  ;;  %p1314_p3 = scmp.lt.u32.totalorder %s1307_s19, %s1816_s1 }
  0x15   : > { %p1613_p12 = pneg %p1597_p10 }
  0x17   : > { %p1310_p13 = pnand %p1613_p12, %p1308_p11 }
  0x19   : > { %p1311_p0 = pneg %p1310_p13 }
  0x1b   : > { %p1316_p5 = pnand %p1314_p3, %p1311_p0 }
  0x1d   : > { %1319 = shalt.err (!%p1316_p5)
}
  0x1e   : > { %s1320_s10 = scalar_lea.vmem %s1591_s11, 2048  ;;  %p1328_p2 = scmp.lt.s32.totalorder %s1591_s11, %s1591_s11 }
  0x1f   : > { %p1321_p7 = scmp.ne.s32.totalorder %s1591_s11, %s1320_s10  ;;  %p1329_p6 = scmp.lt.s32.totalorder %s1320_s10, %s1320_s10 }
  0x21   : > { %p1323_p9 = pnand %p1321_p7, %p1613_p12  ;;  %p1330_p11 = por %p1329_p6, %p1328_p2 }
  0x23   : > { %p1324_p1 = pneg %p1323_p9 }
  0x25   : > { %p1331_p13 = pnand %p1330_p11, %p1324_p1 }
  0x27   : > { %1334 = shalt.err (!%p1331_p13)
}
  0x28   : > { %s1500_s13 = smov 128   ;;  %s1501_s15 = smov 8  }
  0x29   : > { %1156 = dma.hbm_to_vmem [thread:$0]  (!%p1597_p10), %s1816_s1, 2048, %s1591_s11, [#allocation6], %s1500_s13, %s1500_s13, %s1501_s15  }
  0x2a   : > { %s1335_s21 = scalar_lea.hbm %s1818_s3, 4096 }
  0x2b   : > { %p1336_p2 = scmp.ne.s32.totalorder %s1818_s3, %s1335_s21  ;;  %p1342_p0 = scmp.lt.u32.totalorder %s1335_s21, %s1818_s3 }
  0x2d   : > { %p1338_p1 = pnand %p1336_p2, %p1613_p12 }
  0x2f   : > { %p1339_p6 = pneg %p1338_p1 }
  0x31   : > { %p1344_p3 = pnand %p1342_p0, %p1339_p6 }
  0x33   : > { %1347 = shalt.err (!%p1344_p3)
}
  0x34   : > { %s1348_s11 = scalar_lea.vmem %s1601_s14, 4096  ;;  %p1356_p11 = scmp.lt.s32.totalorder %s1601_s14, %s1601_s14 }
  0x35   : > { %p1349_p5 = scmp.ne.s32.totalorder %s1601_s14, %s1348_s11  ;;  %p1357_p13 = scmp.lt.s32.totalorder %s1348_s11, %s1348_s11 }
  0x37   : > { %p1351_p7 = pnand %p1349_p5, %p1613_p12  ;;  %p1358_p2 = por %p1357_p13, %p1356_p11 }
  0x39   : > { %p1352_p9 = pneg %p1351_p7 }
  0x3b   : > { %p1359_p1 = pnand %p1358_p2, %p1352_p9 }
  0x3d   : > { %1362 = shalt.err (!%p1359_p1)
}
  0x3e   : > { %1159 = dma.hbm_to_vmem [thread:$0]  (!%p1597_p10), %s1818_s3, 4096, %s1601_s14, [#allocation6], %s1500_s13, %s1500_s13, %s1501_s15  }
  0x3f   : > { %s1363_s20 = scalar_lea.hbm %s1820_s5, 2048 }
  0x40   : > { %p1364_p6 = scmp.ne.s32.totalorder %s1820_s5, %s1363_s20  ;;  %p1370_p5 = scmp.lt.u32.totalorder %s1363_s20, %s1820_s5 }
  0x42   : > { %p1366_p0 = pnand %p1364_p6, %p1613_p12 }
  0x44   : > { %p1367_p3 = pneg %p1366_p0 }
  0x46   : > { %p1372_p7 = pnand %p1370_p5, %p1367_p3 }
  0x48   : > { %1375 = shalt.err (!%p1372_p7)
}
  0x49   : > { %s1376_s11 = scalar_lea.vmem %s253_s16, 2048  ;;  %p1384_p2 = scmp.lt.s32.totalorder %s253_s16, %s253_s16 }
  0x4a   : > { %p1377_p9 = scmp.ne.s32.totalorder %s253_s16, %s1376_s11  ;;  %p1385_p1 = scmp.lt.s32.totalorder %s1376_s11, %s1376_s11 }
  0x4c   : > { %p1379_p11 = pnand %p1377_p9, %p1613_p12  ;;  %p1386_p4 = por %p1385_p1, %p1384_p2 }
  0x4e   : > { %p1380_p13 = pneg %p1379_p11 }
  0x50   : > { %p1387_p8 = pnand %p1386_p4, %p1380_p13 }
  0x52   : > { %1390 = shalt.err (!%p1387_p8)
}
  0x53   : > { %s1502_s14 = smov 64   ;;  %s1503_s22 = smov 4  }
  0x54   : > { %1162 = dma.hbm_to_vmem [thread:$0]  (!%p1597_p10), %s1820_s5, 2048, %s253_s16, [#allocation9], %s1502_s14, %s1502_s14, %s1503_s22  }
  0x55   : > { %s1677_s8 = sadd.s32 1, %s1495_s27   ;;  %s32_s18 = sadd.s32 1, %s1491_s26 }
  0x56   : > { %s29_s17 = ssub.s32 %s1495_s27, %s1677_s8  ;;  %p39_p8 = scmp.ne.s32.totalorder %s1491_s26, %s1487_s25 }
  0x57   : > { %p30_p4 = scmp.eq.s32.totalorder %s29_s17, 0  ;;  %p40_p12 = scmp.eq.s32.totalorder %s1495_s27, 0 }
  0x58   : > { %p1174_p6 = scmp.lt.s32.totalorder %s1495_s27, 3  ;;  %p1833_p3 = scmp.eq.s32.totalorder %s1568_s28, 2 }
  0x59   : > { %s1687_s19 = scalar_select %p30_p4, %s1491_s26, %s32_s18  }
  0x5a   : > { %p41_p0 = por %p40_p12, %p39_p8  ;;  %p1691_p5 = por %p1833_p3, %p39_p8 }
  0x5b   : > { %s269_s12 = sand.u32 1, %s1491_s26   ;;  %s1039_s21 = sshll.u32 %s1495_s27, 7 }
  0x5c   : > { %s1038_s16 = sshll.u32 %s269_s12, 3  ;;  %s1700_s10 = scalar_lea.hbm %s1815_s0, %s1039_s21 }
  0x5d   : > { %s273_s11 = scalar_lea.vmem [#allocation2], %s1038_s16  ;;  %p1702_p10 = pnand %p1174_p6, %p41_p0 }
  0x5e   : > { %s280_s14 = sshll.u32 %s273_s11, 4  ;;  %s270_s13 = scalar_lea.sflag [#allocation3], %s269_s12  ;;  %s1706_s14 = int_to_ptr.vmem [resolvable:$true] %s280_s14 }
  0x5f   : > { %s1391_s15 = scalar_lea.hbm %s1700_s10, 128  ;;  %p1393_p9 = pneg %p1702_p10 }
  0x60   : > { %p1392_p7 = scmp.ne.s32.totalorder %s1700_s10, %s1391_s15  ;;  %s1396_s21 = scalar_lea.hbm %s1815_s0, 384 }
  0x61   : > { %p1397_p2 = scmp.lt.u32.totalorder %s1700_s10, %s1815_s0  ;;  %p1398_p1 = scmp.lt.u32.totalorder %s1396_s21, %s1391_s15 }
  0x62   : > { %p1394_p11 = pnand %p1393_p9, %p1392_p7  ;;  %p1400_p8 = scmp.lt.u32.totalorder %s1391_s15, %s1700_s10 }
  0x63   : > { %p1399_p4 = por %p1398_p1, %p1397_p2 }
  0x64   : > { %p1395_p13 = pneg %p1394_p11 }
  0x65   : > { %p1401_p12 = por %p1400_p8, %p1399_p4 }
  0x67   : > { %p1402_p6 = pnand %p1401_p12, %p1395_p13 }
  0x69   : > { %1405 = shalt.err (!%p1402_p6)
}
  0x6a   : > { %s1406_s12 = scalar_lea.vmem %s1706_s14, 128  ;;  %s1504_s29 = smov [#allocation2]  }
  0x6b   : > { %p1407_p0 = scmp.ne.s32.totalorder %s1706_s14, %s1406_s12  ;;  %s1411_s11 = sshll.u32 %s1504_s29, 4  ;;  %s1412_s11 = int_to_ptr.vmem [resolvable:$false] %s1411_s11 }
  0x6c   : > { %s1413_s17 = scalar_lea.vmem %s1412_s11, 256  ;;  %p1414_p11 = scmp.lt.s32.totalorder %s1706_s14, %s1412_s11 }
  0x6d   : > { %p1409_p3 = pnand %p1407_p0, %p1393_p9  ;;  %p1415_p2 = scmp.lt.s32.totalorder %s1413_s17, %s1406_s12 }
  0x6f   : > { %p1410_p7 = pneg %p1409_p3  ;;  %p1416_p1 = por %p1415_p2, %p1414_p11 }
  0x71   : > { %p1417_p4 = pnand %p1416_p1, %p1410_p7 }
  0x73   : > { %1420 = shalt.err (!%p1417_p4)
}
  0x74   : > { %1166 = dma.hbm_to_vmem [thread:$0]  (!%p1702_p10), %s1700_s10, 128, %s1706_s14, %s270_s13  }
  0x75   : > { %p1836_p13 = scmp.ne.s32.totalorder %s1830_s9, 0 }
  0x76   : > { %s1736_s15 = sand.u32 (!%p1836_p13), 1, %s1487_s25   ;;  %p1837_p9 = scmp.ne.s32.totalorder (!%p1836_p13), %s1827_s30, 0 }
  0x77   : > { %289 = sbr.rel (%p1836_p13) target bundleno = 838 (0x346), region = 48  ;;  %s1041_s18 = sshll.u32 (!%p1836_p13), %s1736_s15, 3 }
  0x78   : > { %s292_s21 = scalar_lea.sflag (!%p1836_p13), [#allocation3], %s1736_s15  ;;  %s1742_s16 = scalar_lea.vmem (!%p1836_p13), [#allocation2], %s1041_s18 }
  0x7e   : > { %1466 = dma.done.wait (%p1837_p9), %s292_s21, 128  }
  0x7f   : > { %1468 = vsyncadd (%p1837_p9), %s292_s21, 4294967168  ;;  %p1838_p10 = scmp.eq.s32.totalorder %s1568_s28, 0 }
  0x81   : > { %1470 = dma.done.wait (%p1838_p10), [#allocation6], 6144   ;;  %p1839_p8 = pmov %p1838_p10 }
  0x83   : > { %1472 = vsyncadd (%p1839_p8), [#allocation6], 4294961152  ;;  %p1840_p12 = pmov %p1839_p8 }
  0x84   : > { %p1841_p6 = pmov %p1839_p8 }
  0x85   : > { %1474 = dma.done.wait (%p1840_p12), [#allocation9], 2048  }
  0x86   : > { %1476 = vsyncadd (%p1841_p6), [#allocation9], 4294965248  ;;  %v1505_v0 = vmov 0   ;;  %v1219_v1 = vld [vmem:[#allocation5 + $0x4] ss:$8 sps:$4 sm:$0xff]   ;;  %v339_v26 = vld [vmem:[%s1742_s16] sm:$0xff]  ;;  %v359_v63 = vlaneseq }
  0x87   : > { %481 = vmatprep.mubr.bf16.mxu0 %v1505_v0  ;;  %v1221_v2 = vld [vmem:[#allocation5] ss:$8 sps:$4 sm:$0xff]   ;;  %449 = vmatprep.subr.bf16.mxu0 %v1219_v1  ;;  %v1222_v3 = vld [vmem:[#allocation5 + $0x14] ss:$8 sps:$4 sm:$0xff]   ;;  %v1224_v4 = vld [vmem:[#allocation5 + $0x10] ss:$8 sps:$4 sm:$0xff]   ;;  %v340_v31 = vpack.c.bf16 %v339_v26, %v339_v26 }
  0x88   : > { %450 = vmatpush1.bf16.msra.mxu0 %v1221_v2  ;;  %v1225_v5 = vld [vmem:[#allocation5 + $0x24] ss:$8 sps:$4 sm:$0xff]   ;;  %v1227_v6 = vld [vmem:[#allocation5 + $0x20] ss:$8 sps:$4 sm:$0xff]   ;;  %v1228_v7 = vld [vmem:[#allocation5 + $0x34] ss:$8 sps:$4 sm:$0xff]  }
  0x89   : > { %451 = vmatprep.subr.bf16.mxu0 %v1222_v3  ;;  %v1230_v8 = vld [vmem:[#allocation5 + $0x30] ss:$8 sps:$4 sm:$0xff]   ;;  %v1231_v9 = vld [vmem:[#allocation5 + $0x44] ss:$8 sps:$4 sm:$0xff]   ;;  %v1245_v11 = vld [vmem:[#allocation7] ss:$8 sps:$4 sm:$0xff]  }
  0x8a   : > { %v1243_v10 = vld [vmem:[#allocation7 + $0x4] ss:$8 sps:$4 sm:$0xff]   ;;  %v1246_v12 = vld [vmem:[#allocation7 + $0x14] ss:$8 sps:$4 sm:$0xff]   ;;  %v1233_v13 = vld [vmem:[#allocation5 + $0x40] ss:$8 sps:$4 sm:$0xff]  }
  0x8b   : > { %698 = vmatprep.subr.bf16.mxu1 %v1243_v10  ;;  %v1248_v14 = vld [vmem:[#allocation7 + $0x10] ss:$8 sps:$4 sm:$0xff]   ;;  %v1249_v15 = vld [vmem:[#allocation7 + $0x24] ss:$8 sps:$4 sm:$0xff]   ;;  %v1234_v16 = vld [vmem:[#allocation5 + $0x54] ss:$8 sps:$4 sm:$0xff]  }
  0x8c   : > { %452 = vmatpush1.bf16.msra.mxu0 %v1224_v4  ;;  %699 = vmatpush1.bf16.msra.mxu1 %v1245_v11  ;;  %v1236_v17 = vld [vmem:[#allocation5 + $0x50] ss:$8 sps:$4 sm:$0xff]   ;;  %v1251_v18 = vld [vmem:[#allocation7 + $0x20] ss:$8 sps:$4 sm:$0xff]   ;;  %v1252_v19 = vld [vmem:[#allocation7 + $0x34] ss:$8 sps:$4 sm:$0xff]  }
  0x8d   : > { %453 = vmatprep.subr.bf16.mxu0 %v1225_v5  ;;  %700 = vmatprep.subr.bf16.mxu1 %v1246_v12  ;;  %v1237_v20 = vld [vmem:[#allocation5 + $0x64] ss:$8 sps:$4 sm:$0xff]   ;;  %v1239_v21 = vld [vmem:[#allocation5 + $0x60] ss:$8 sps:$4 sm:$0xff]   ;;  %v1254_v22 = vld [vmem:[#allocation7 + $0x30] ss:$8 sps:$4 sm:$0xff]  }
  0x8e   : > { %v1255_v23 = vld [vmem:[#allocation7 + $0x44] ss:$8 sps:$4 sm:$0xff]   ;;  %v1240_v24 = vld [vmem:[#allocation5 + $0x74] ss:$8 sps:$4 sm:$0xff]   ;;  %v1242_v25 = vld [vmem:[#allocation5 + $0x70] ss:$8 sps:$4 sm:$0xff]  }
  0x8f   : > { %v1257_v27 = vld [vmem:[#allocation7 + $0x40] ss:$8 sps:$4 sm:$0xff]   ;;  %v1258_v28 = vld [vmem:[#allocation7 + $0x54] ss:$8 sps:$4 sm:$0xff]   ;;  %v1260_v29 = vld [vmem:[#allocation7 + $0x50] ss:$8 sps:$4 sm:$0xff]  }
  0x90   : > { %454 = vmatpush1.bf16.msra.mxu0 %v1227_v6  ;;  %701 = vmatpush1.bf16.msra.mxu1 %v1248_v14  ;;  %v1261_v30 = vld [vmem:[#allocation7 + $0x64] ss:$8 sps:$4 sm:$0xff]   ;;  %v1263_v32 = vld [vmem:[#allocation7 + $0x60] ss:$8 sps:$4 sm:$0xff]   ;;  %v1264_v33 = vld [vmem:[#allocation7 + $0x74] ss:$8 sps:$4 sm:$0xff]  }
  0x91   : > { %455 = vmatprep.subr.bf16.mxu0 %v1228_v7  ;;  %702 = vmatprep.subr.bf16.mxu1 %v1249_v15  ;;  %v1266_v34 = vld [vmem:[#allocation7 + $0x70] ss:$8 sps:$4 sm:$0xff]   ;;  %v1267_v35 = vld [vmem:[#allocation7 + $0x84] ss:$8 sps:$4 sm:$0xff]   ;;  %v1269_v36 = vld [vmem:[#allocation7 + $0x80] ss:$8 sps:$4 sm:$0xff]  }
  0x92   : > { %v1270_v37 = vld [vmem:[#allocation7 + $0x94] ss:$8 sps:$4 sm:$0xff]   ;;  %v1272_v38 = vld [vmem:[#allocation7 + $0x90] ss:$8 sps:$4 sm:$0xff]   ;;  %v1273_v39 = vld [vmem:[#allocation7 + $0xa4] ss:$8 sps:$4 sm:$0xff]  }
  0x93   : > { %v1275_v40 = vld [vmem:[#allocation7 + $0xa0] ss:$8 sps:$4 sm:$0xff]   ;;  %v1276_v41 = vld [vmem:[#allocation7 + $0xb4] ss:$8 sps:$4 sm:$0xff]   ;;  %v1278_v42 = vld [vmem:[#allocation7 + $0xb0] ss:$8 sps:$4 sm:$0xff]  }
  0x94   : > { %456 = vmatpush1.bf16.msra.mxu0 %v1230_v8  ;;  %703 = vmatpush1.bf16.msra.mxu1 %v1251_v18  ;;  %v1279_v43 = vld [vmem:[#allocation7 + $0xc4] ss:$8 sps:$4 sm:$0xff]   ;;  %v1281_v44 = vld [vmem:[#allocation7 + $0xc0] ss:$8 sps:$4 sm:$0xff]   ;;  %v1282_v45 = vld [vmem:[#allocation7 + $0xd4] ss:$8 sps:$4 sm:$0xff]  }
  0x95   : > { %457 = vmatprep.subr.bf16.mxu0 %v1231_v9  ;;  %704 = vmatprep.subr.bf16.mxu1 %v1252_v19  ;;  %v1284_v46 = vld [vmem:[#allocation7 + $0xd0] ss:$8 sps:$4 sm:$0xff]   ;;  %v1285_v47 = vld [vmem:[#allocation7 + $0xe4] ss:$8 sps:$4 sm:$0xff]   ;;  %v1287_v48 = vld [vmem:[#allocation7 + $0xe0] ss:$8 sps:$4 sm:$0xff]  }
  0x96   : > { %v1288_v49 = vld [vmem:[#allocation7 + $0xf4] ss:$8 sps:$4 sm:$0xff]   ;;  %v1290_v50 = vld [vmem:[#allocation7 + $0xf0] ss:$8 sps:$4 sm:$0xff]   ;;  %v1291_v51 = vld [vmem:[#allocation8 + $0x40] sm:$0xff]   ;;  %v360_v0 = vshrl.u32 %v359_v63, 7 }
  0x97   : > { %v1292_v52 = vld [vmem:[#allocation8] sm:$0xff]   ;;  %v1293_v53 = vld [vmem:[#allocation8 + $0x48] sm:$0xff]   ;;  %v1295_v55 = vld [vmem:[#allocation8 + $0x50] sm:$0xff]   ;;  %s1112_s23 = sshll.u32 %s1568_s28, 7  ;;  %s337_s12 = scalar_lea.vmem [#allocation10], %s1041_s18 }
  0x98   : > { %458 = vmatpush1.bf16.msra.mxu0 %v1233_v13  ;;  %705 = vmatpush1.bf16.msra.mxu1 %v1254_v22  ;;  %v1294_v54 = vld [vmem:[#allocation8 + $0x8] sm:$0xff]   ;;  %v1296_v56 = vld [vmem:[#allocation8 + $0x10] sm:$0xff]   ;;  %v1297_v57 = vld [vmem:[#allocation8 + $0x58] sm:$0xff]   ;;  %v361_v1 = vsub.s32 0, %v360_v0  ;;  %v365_v3 = vsub.s32 1, %v360_v0  ;;  %s933_s29 = sshll.u32 %s337_s12, 4  ;;  %s1772_s21 = scalar_lea.hbm %s1822_s7, %s1112_s23  ;;  %s1774_s29 = int_to_ptr.vmem [resolvable:$true] %s933_s29 }
  0x99   : > { %459 = vmatprep.subr.bf16.mxu0 %v1234_v16  ;;  %706 = vmatprep.subr.bf16.mxu1 %v1255_v23  ;;  %v1298_v58 = vld [vmem:[#allocation8 + $0x18] sm:$0xff]   ;;  %v1299_v59 = vld [vmem:[#allocation8 + $0x60] sm:$0xff]   ;;  %v1301_v61 = vld [vmem:[#allocation8 + $0x68] sm:$0xff]   ;;  %s920_s16 = scalar_lea.sflag [#allocation4], %s1736_s15  ;;  %s1421_s28 = scalar_lea.vmem %s1774_s29, 128 }
  0x9a   : > { %v1300_v60 = vld [vmem:[#allocation8 + $0x20] sm:$0xff]   ;;  %v1302_v62 = vld [vmem:[#allocation8 + $0x28] sm:$0xff]   ;;  %v357_v2 = vld [vmem:[%s1817_s2] sm:$0x3]  ;;  %p1422_p0 = scmp.ne.s32.totalorder %s1774_s29, %s1421_s28  ;;  %s1506_s18 = smov [#allocation10]  }
  0x9b   : > { %v362_v4 = vrot.slane %v357_v2, %v361_v1  ;;  %v366_v5 = vrot.slane %v357_v2, %v365_v3  ;;  %v1303_v16 = vld [vmem:[#allocation8 + $0x70] sm:$0xff]   ;;  %v1305_v18 = vld [vmem:[#allocation8 + $0x78] sm:$0xff]   ;;  %s1425_s30 = sshll.u32 %s1506_s18, 4  ;;  %s1426_s30 = int_to_ptr.vmem [resolvable:$false] %s1425_s30 }
  0x9c   : > { %460 = vmatpush1.bf16.msra.mxu0 %v1236_v17  ;;  %707 = vmatpush1.bf16.msra.mxu1 %v1257_v27  ;;  %v1304_v17 = vld [vmem:[#allocation8 + $0x30] sm:$0xff]   ;;  %v1306_v19 = vld [vmem:[#allocation8 + $0x38] sm:$0xff]   ;;  %p1423_p3 = pnand %p1422_p0, %p1691_p5  ;;  %s1427_s9 = scalar_lea.vmem %s1426_s30, 256 }
  0x9d   : > { %461 = vmatprep.subr.bf16.mxu0 %v1237_v20  ;;  %708 = vmatprep.subr.bf16.mxu1 %v1258_v28  ;;  %v526_v20 = vld [vmem:[%s1819_s4] sm:$0x3]  ;;  %p1428_p11 = scmp.lt.s32.totalorder %s1774_s29, %s1426_s30  ;;  %p1429_p2 = scmp.lt.s32.totalorder %s1427_s9, %s1421_s28 }
  0x9e   : > { %v535_v22 = vrot.slane %v526_v20, %v365_v3  ;;  %p1424_p7 = pneg %p1423_p3 }
  0x9f   : > { %p1430_p1 = por %p1429_p2, %p1428_p11 }
  0xa0   : > { %462 = vmatpush1.bf16.msra.mxu0 %v1239_v21  ;;  %709 = vmatpush1.bf16.msra.mxu1 %v1260_v29  ;;  %v531_v21 = vrot.slane %v526_v20, %v361_v1 }
  0xa1   : > { %463 = vmatprep.subr.bf16.mxu0 %v1240_v24  ;;  %710 = vmatprep.subr.bf16.mxu1 %v1261_v30  ;;  %p1431_p4 = pnand %p1430_p1, %p1424_p7 }
  0xa4   : > { %464 = vmatpush1.bf16.msra.mxu0 %v1242_v25  ;;  %711 = vmatpush1.bf16.msra.mxu1 %v1263_v32 }
  0xa5   : > { %712 = vmatprep.subr.bf16.mxu1 %v1264_v33  ;;  %1115 = vmatprep.subr.bf16.mxu0 %v1291_v51 }
  0xa7   : > { %482 = vmatmul.mubr.bf16.vlgmr.msra.gmra.mrb[0].mxu0 %v340_v31 }
  0xa8   : > { %713 = vmatpush1.bf16.msra.mxu1 %v1266_v34  ;;  %1116 = vmatpush3.bf16.msra.mxu0 %v1292_v52  ;;  %v1094_v34 = vld [vmem:[%s1821_s6] ss:$0 sm:$0xff] }
  0xa9   : > { %714 = vmatprep.subr.bf16.mxu1 %v1267_v35  ;;  %1117 = vmatprep.subr.bf16.mxu0 %v1293_v53 }
  0xac   : > { %715 = vmatpush1.bf16.msra.mxu1 %v1269_v36  ;;  %1118 = vmatpush3.bf16.msra.mxu0 %v1294_v54 }
  0xad   : > { %716 = vmatprep.subr.bf16.mxu1 %v1270_v37  ;;  %1119 = vmatprep.subr.bf16.mxu0 %v1295_v55 }
  0xb0   : > { %717 = vmatpush1.bf16.msra.mxu1 %v1272_v38  ;;  %1120 = vmatpush3.bf16.msra.mxu0 %v1296_v56 }
  0xb1   : > { %718 = vmatprep.subr.bf16.mxu1 %v1273_v39  ;;  %1121 = vmatprep.subr.bf16.mxu0 %v1297_v57 }
  0xb4   : > { %719 = vmatpush1.bf16.msra.mxu1 %v1275_v40  ;;  %1122 = vmatpush3.bf16.msra.mxu0 %v1298_v58 }
  0xb5   : > { %720 = vmatprep.subr.bf16.mxu1 %v1276_v41  ;;  %1123 = vmatprep.subr.bf16.mxu0 %v1299_v59 }
  0xb8   : > { %721 = vmatpush1.bf16.msra.mxu1 %v1278_v42  ;;  %1124 = vmatpush3.bf16.msra.mxu0 %v1300_v60 }
  0xb9   : > { %722 = vmatprep.subr.bf16.mxu1 %v1279_v43  ;;  %1125 = vmatprep.subr.bf16.mxu0 %v1301_v61 }
  0xbc   : > { %723 = vmatpush1.bf16.msra.mxu1 %v1281_v44  ;;  %1126 = vmatpush3.bf16.msra.mxu0 %v1302_v62 }
  0xbd   : > { %724 = vmatprep.subr.bf16.mxu1 %v1282_v45  ;;  %1127 = vmatprep.subr.bf16.mxu0 %v1303_v16 }
  0xc0   : > { %725 = vmatpush1.bf16.msra.mxu1 %v1284_v46  ;;  %1128 = vmatpush3.bf16.msra.mxu0 %v1304_v17 }
  0xc1   : > { %726 = vmatprep.subr.bf16.mxu1 %v1285_v47  ;;  %1129 = vmatprep.subr.bf16.mxu0 %v1305_v18 }
  0xc4   : > { %727 = vmatpush1.bf16.msra.mxu1 %v1287_v48  ;;  %1130 = vmatpush3.bf16.msra.mxu0 %v1306_v19 }
  0xc5   : > { %728 = vmatprep.subr.bf16.mxu1 %v1288_v49 }
  0xc8   : > { %729 = vmatpush1.bf16.msra.mxu1 %v1290_v50 }
 0x17a   : > { %v483_v6 = vpop.f32.mrb[0].mxu0 }
 0x17b   : > { %v484_v7 = vadd.f32 %v483_v6, %v362_v4  ;;  %v485_v8 = vpop.f32.mrb[1].mxu0 }
 0x17c   : > { %v486_v9 = vadd.f32 %v485_v8, %v366_v5  ;;  %v487_v10 = vpop.f32.mrb[2].mxu0 }
 0x17d   : > { %v490_v11 = vmax.f32 %v484_v7, 0.0  ;;  %v488_v12 = vpop.f32.mrb[3].mxu0 }
 0x17e   : > { %v491_v13 = vmax.f32 %v486_v9, 0.0 }
 0x17f   : > { %v492_v15 = vpack.c.bf16 %v490_v11, %v490_v11 }
 0x180   : > { %v493_v14 = vpack.c.bf16 %v491_v13, %v491_v13 }
 0x182   : > { %730 = vmatprep.mubr.bf16.mxu1 %v493_v14 }
 0x183   : > { %731 = vmatmul.mubr.bf16.vlgmr.msra.gmra.mrb[0].mxu1 %v492_v15 }
 0x256   : > { %v732_v23 = vpop.f32.mrb[0].mxu1 }
 0x257   : > { %v733_v24 = vadd.f32 %v732_v23, %v531_v21  ;;  %v734_v25 = vpop.f32.mrb[1].mxu1 }
 0x258   : > { %v735_v26 = vadd.f32 %v734_v25, %v535_v22  ;;  %v736_v27 = vpop.f32.mrb[2].mxu1 }
 0x259   : > { %v739_v28 = vmax.f32 %v733_v24, 0.0  ;;  %v737_v29 = vpop.f32.mrb[3].mxu1 }
 0x25a   : > { %v740_v30 = vmax.f32 %v735_v26, 0.0 }
 0x25b   : > { %v741_v32 = vpack.c.bf16 %v739_v28, %v739_v28 }
 0x25c   : > { %v742_v31 = vpack.c.bf16 %v740_v30, %v740_v30 }
 0x25e   : > { %910 = vmatprep.mubr.bf16.mxu0 %v742_v31 }
 0x25f   : > { %911 = vmatmul.mubr.bf16.vlgmr.msra.gmra.mrb[4].mxu0 %v741_v32 }
 0x332   : > { %v1131_v33 = vpop.f32.mrb[4].mxu0 }
 0x333   : > { %v1132_v35 = vpop.f32.mrb[5].mxu0 }
 0x334   : > { %v1133_v36 = vadd.f32 %v1132_v35, %v1131_v33  ;;  %v1134_v37 = vpop.f32.mrb[6].mxu0 }
 0x335   : > { %v1135_v38 = vpop.f32.mrb[7].mxu0 }
 0x336   : > { %v913_v39 = vadd.f32 %v1133_v36, %v1094_v34 }
 0x338   : > { %918 = vst [vmem:[%s337_s12] sm:$0xff] %v913_v39 }
 0x339   : > { %1434 = shalt.err (!%p1431_p4)
}
 0x33a   : > { %s1435_s15 = scalar_lea.hbm %s1772_s21, 128  ;;  %s1439_s22 = scalar_lea.hbm %s1822_s7, 384 }
 0x33b   : > { %p1436_p13 = scmp.ne.s32.totalorder %s1772_s21, %s1435_s15  ;;  %p1440_p8 = scmp.lt.u32.totalorder %s1772_s21, %s1822_s7 }
 0x33c   : > { %p1441_p12 = scmp.lt.u32.totalorder %s1439_s22, %s1435_s15  ;;  %p1443_p0 = scmp.lt.u32.totalorder %s1435_s15, %s1772_s21 }
 0x33d   : > { %p1437_p9 = pnand %p1436_p13, %p1691_p5 }
 0x33e   : > { %p1442_p6 = por %p1441_p12, %p1440_p8 }
 0x33f   : > { %p1438_p10 = pneg %p1437_p9 }
 0x340   : > { %p1444_p3 = por %p1443_p0, %p1442_p6 }
 0x342   : > { %p1445_p7 = pnand %p1444_p3, %p1438_p10 }
 0x344   : > { %1448 = shalt.err (!%p1445_p7)
}
 0x345   : > { %1151 = dma.vmem_to_hbm [thread:$0]  (%p1691_p5), %s1774_s29, 128, %s1772_s21, %s920_s16  }
 0x346 PF: > { %s1842_s12 = sld [smem:[#allocation15_spill]]  ;;  %p1178_p11 = scmp.ge.s32.totalorder %s1495_s27, 2 }
 0x347   : > { %s945_s11 = sand.u32 1, %s1483_s24  }
 0x348   : > { %s946_s17 = scalar_lea.sflag [#allocation4], %s945_s11 }
 0x34c   : > { %p1843_p2 = scmp.ne.s32.totalorder %s1842_s12, 0 }
 0x34e   : > { %p1168_p1 = pnand %p1178_p11, %p1843_p2 }
 0x350   : > { %1478 = dma.done.wait (!%p1168_p1), %s946_s17, 128  }
 0x351   : > { %1480 = vsyncadd (!%p1168_p1), %s946_s17, 4294967168  ;;  %p22_p4 = scmp.ge.s32.totalorder %s1677_s8, 5   ;;  %s1844_s24 = smov %s1487_s25 }
 0x352   : > { %s1845_s25 = smov %s1491_s26  ;;  %s1846_s26 = smov %s1687_s19 }
 0x353   : > { %s1847_s27 = smov %s1677_s8  ;;  %24 = sbr.rel (!%p22_p4) target bundleno = 7 (0x7), region = 105 }
 0x35a   :  { %951 = vsyncpa [#allocation3], 1 }
 0x35b   :  { %953 = vsyncpa [#allocation3 + $0x1], 1 }
 0x35c   :  { %954 = vsyncpa [#allocation6], 1 }
 0x35d   :  { %955 = vsyncpa [#allocation9], 1 }
 0x35e   :  { %956 = vsyncpa [#allocation4], 1 }
 0x35f   :  { %958 = vsyncpa [#allocation4 + $0x1], 1 }

</bundles_post_ra>
